<compile_context>
chip_gen: v5e
topology: v5e:2x2
jax: 0.10.0
libtpu: 0.0.40
codegen_flags: <defaults>
</compile_context>

<pallas_src>
import jax
import jax.numpy as jnp
from jax.experimental import pallas as pl
from jax.experimental.pallas import tpu as pltpu

_VMEM_LIMIT_BYTES = 32 << 20  # scoped-VMEM budget; safe on v5e/v6e (128 MiB) and v7x (64 MiB)


def _mlp_softmax_kernel(x_ref, w1_ref, b1_ref, w2_ref, b2_ref, out_ref):
    # x_ref: (TB, I); w1_ref: (I, H); b1_ref: (1, H); w2_ref: (H, O); b2_ref: (1, O);
    # out_ref: (TB, O).  Weights are pre-transposed at init, so both dots are plain
    # row-major contractions on the MXU with f32 accumulation.
    x = x_ref[...]

    # fc1 + ReLU
    h = jnp.dot(x, w1_ref[...], preferred_element_type=jnp.float32)
    h = jnp.maximum(h + b1_ref[...], 0.0)

    # fc2
    logits = jnp.dot(h, w2_ref[...], preferred_element_type=jnp.float32)
    logits = logits + b2_ref[...]

    # Numerically-stable softmax over dim=1 (feature axis), kept entirely in f32.
    # NOTE: if B is not a multiple of TB, the padded rows of the last tile run exp() on
    # undefined data; their stores are clipped by Pallas, so valid rows are unaffected.
    m = jnp.max(logits, axis=1, keepdims=True)
    e = jnp.exp(logits - m)
    denom = jnp.sum(e, axis=1, keepdims=True)
    out_ref[...] = (e / denom).astype(out_ref.dtype)  # exact divide -> rows sum to 1


def _choose_batch_tile(B, I, H, O, vmem_limit_bytes):
    """Pick the batch tile TB (perf-review items 2/3/4).

    Budget = vmem_limit (minus headroom) - resident weights (double-buffer worst case);
    per-row cost covers double-buffered x/out tiles plus f32 hidden/logits intermediates.
    TB is capped at 2048 and rounded down to a multiple of 8.  When 16 <= B fits in a
    single tile we still split into 2 tiles so v7x's two TensorCores both get work.
    """
    resident_w = 4 * (I * H + H + H * O + O)
    budget = max(vmem_limit_bytes - 2 * resident_w - (4 << 20), 1 << 20)
    per_row = 4 * (2 * (I + O) + 2 * H)
    tb = min(budget // per_row, 2048)
    tb = max(8, (tb // 8) * 8)

    if B <= tb:
        if B >= 16:
            half = -(-B // 2)            # ceil(B / 2)
            half = -(-half // 8) * 8     # round up to a multiple of 8
            return int(min(half, tb))    # >= 2 grid steps -> both TCs busy on v7x
        return int(B)                    # tiny batch: single tile equal to the full dim
    return int(tb)


def smart_contract_forward(x, w1, b1, w2, b2):
    """x: (B, I) f32; w1: (I, H); b1: (1, H); w2: (H, O); b2: (1, O).
    Weights are already in (in, out) layout (hoisted once at init), so there is no
    per-call transpose/reshape glue here."""
    B, I = x.shape
    H = w1.shape[1]
    O = w2.shape[1]

    TB = _choose_batch_tile(B, I, H, O, _VMEM_LIMIT_BYTES)
    grid = (pl.cdiv(B, TB),)

    flops = 2 * B * (I * H + H * O)
    bytes_accessed = 4 * (B * I + I * H + H + H * O + O + B * O)

    return pl.pallas_call(
        _mlp_softmax_kernel,
        out_shape=jax.ShapeDtypeStruct((B, O), jnp.float32),
        grid_spec=pltpu.PrefetchScalarGridSpec(
            num_scalar_prefetch=0,
            grid=grid,
            in_specs=[
                pl.BlockSpec((TB, I), lambda i: (i, 0)),   # activations: tiled over batch
                pl.BlockSpec((I, H), lambda i: (0, 0)),    # weights/biases: constant block
                pl.BlockSpec((1, H), lambda i: (0, 0)),    # index -> VMEM-resident across
                pl.BlockSpec((H, O), lambda i: (0, 0)),    # all batch tiles
                pl.BlockSpec((1, O), lambda i: (0, 0)),
            ],
            out_specs=pl.BlockSpec((TB, O), lambda i: (i, 0)),
        ),
        compiler_params=pltpu.CompilerParams(
            # Batch axis is embarrassingly parallel: shards across both TCs on v7x,
            # harmless on single-TC v5e/v6e.
            dimension_semantics=("parallel",),
            vmem_limit_bytes=_VMEM_LIMIT_BYTES,
        ),
        cost_estimate=pl.CostEstimate(
            flops=flops,
            transcendentals=B * O,          # one exp per logit
            bytes_accessed=bytes_accessed,
        ),
    )(x, w1, b1, w2, b2)


# Jitted entry point (shapes are static, so TB/grid resolve at trace time).
smart_contract_forward_jit = jax.jit(smart_contract_forward)


def _init_linear(key, in_features, out_features):
    """Deterministic init mimicking torch.nn.Linear default (U[-1/sqrt(fan_in), +bound]).
    The weight is stored pre-transposed in (in, out) layout and the bias as (1, out) so
    the forward path has zero per-call layout glue and the kernel needs no transpose."""
    k_w, k_b = jax.random.split(key)
    bound = 1.0 / jnp.sqrt(jnp.float32(in_features))
    w = jax.random.uniform(k_w, (in_features, out_features), jnp.float32, -bound, bound)
    b = jax.random.uniform(k_b, (1, out_features), jnp.float32, -bound, bound)
    return w, b


if __name__ == "__main__":
    key = jax.random.PRNGKey(0)
    k_x, k_fc1, k_fc2 = jax.random.split(key, 3)

    batch = 2
    input_size = 16
    hidden_size = 32
    output_size = 8

    x = jax.random.normal(k_x, (batch, input_size), jnp.float32)
    w1, b1 = _init_linear(k_fc1, input_size, hidden_size)
    w2, b2 = _init_linear(k_fc2, hidden_size, output_size)

    out = smart_contract_forward_jit(x, w1, b1, w2, b2)
    out = jax.block_until_ready(out)

    # Reference check in plain JAX (same math as the PyTorch module).
    h_ref = jnp.maximum(x @ w1 + b1, 0.0)
    logits_ref = h_ref @ w2 + b2
    ref = jax.nn.softmax(logits_ref, axis=1)

    assert out.shape == (batch, output_size), "bad output shape"
    assert jnp.allclose(out, ref, atol=1e-5, rtol=1e-5), "mismatch vs reference"
    assert jnp.allclose(jnp.sum(out, axis=1), 1.0, atol=1e-5), "softmax rows must sum to 1"

    print("KERNEL_OK")
</pallas_src>

<mosaic_0001>
module attributes {stable_mosaic.version = 11 : i64} {
  func.func @_mlp_softmax_kernel(%arg0: i32, %arg1: memref<2x16xf32, #tpu.memory_space<vmem>>, %arg2: memref<16x32xf32, #tpu.memory_space<vmem>>, %arg3: memref<1x32xf32, #tpu.memory_space<vmem>>, %arg4: memref<32x8xf32, #tpu.memory_space<vmem>>, %arg5: memref<1x8xf32, #tpu.memory_space<vmem>>, %arg6: memref<2x8xf32, #tpu.memory_space<vmem>>) attributes {dimension_semantics = [#tpu.dimension_semantics<parallel>], iteration_bounds = array<i64: 1>, scalar_prefetch = 0 : i64, scratch_operands = 0 : i64, tpu.core_type = #tpu.core_type<tc>, window_params = [{transform_indices = @transform_0, window_bounds = array<i64: 2, 16>}, {pipeline_mode = #tpu.pipeline_mode<synchronous>, transform_indices = @transform_1, window_bounds = array<i64: 16, 32>}, {pipeline_mode = #tpu.pipeline_mode<synchronous>, transform_indices = @transform_2, window_bounds = array<i64: 1, 32>}, {pipeline_mode = #tpu.pipeline_mode<synchronous>, transform_indices = @transform_3, window_bounds = array<i64: 32, 8>}, {pipeline_mode = #tpu.pipeline_mode<synchronous>, transform_indices = @transform_4, window_bounds = array<i64: 1, 8>}, {transform_indices = @transform_5, window_bounds = array<i64: 2, 8>}]} {
    %c0 = arith.constant 0 : index
    %c0_0 = arith.constant 0 : index
    %0 = vector.load %arg1[%c0, %c0_0] : memref<2x16xf32, #tpu.memory_space<vmem>>, vector<2x16xf32>
    %c0_1 = arith.constant 0 : index
    %c0_2 = arith.constant 0 : index
    %1 = vector.load %arg2[%c0_1, %c0_2] : memref<16x32xf32, #tpu.memory_space<vmem>>, vector<16x32xf32>
    %cst = arith.constant dense<0.000000e+00> : vector<2x32xf32>
    %2 = tpu.matmul %0, %1, %cst {dimension_numbers = #tpu.dot_dimension_numbers<[1], [0], [0], [1], [0, 0, 1, 1], [], []>} : vector<2x16xf32>, vector<16x32xf32>, vector<2x32xf32> -> vector<2x32xf32>
    %c0_3 = arith.constant 0 : index
    %c0_4 = arith.constant 0 : index
    %3 = vector.load %arg3[%c0_3, %c0_4] : memref<1x32xf32, #tpu.memory_space<vmem>>, vector<1x32xf32>
    %4 = vector.broadcast %3 : vector<1x32xf32> to vector<2x32xf32>
    %5 = arith.addf %2, %4 : vector<2x32xf32>
    %cst_5 = arith.constant 0.000000e+00 : f32
    %6 = vector.broadcast %cst_5 : f32 to vector<2x32xf32>
    %7 = arith.maximumf %5, %6 : vector<2x32xf32>
    %c0_6 = arith.constant 0 : index
    %c0_7 = arith.constant 0 : index
    %8 = vector.load %arg4[%c0_6, %c0_7] : memref<32x8xf32, #tpu.memory_space<vmem>>, vector<32x8xf32>
    %cst_8 = arith.constant dense<0.000000e+00> : vector<2x8xf32>
    %9 = tpu.matmul %7, %8, %cst_8 {dimension_numbers = #tpu.dot_dimension_numbers<[1], [0], [0], [1], [0, 0, 1, 1], [], []>} : vector<2x32xf32>, vector<32x8xf32>, vector<2x8xf32> -> vector<2x8xf32>
    %c0_9 = arith.constant 0 : index
    %c0_10 = arith.constant 0 : index
    %10 = vector.load %arg5[%c0_9, %c0_10] : memref<1x8xf32, #tpu.memory_space<vmem>>, vector<1x8xf32>
    %11 = vector.broadcast %10 : vector<1x8xf32> to vector<2x8xf32>
    %12 = arith.addf %9, %11 : vector<2x8xf32>
    %cst_11 = arith.constant dense<0xFF800000> : vector<2xf32>
    %13 = vector.multi_reduction <maximumf>, %12, %cst_11 [1] : vector<2x8xf32> to vector<2xf32>
    %14 = vector.shape_cast %13 : vector<2xf32> to vector<2x1xf32>
    %15 = vector.broadcast %14 : vector<2x1xf32> to vector<2x8xf32>
    %16 = arith.subf %12, %15 : vector<2x8xf32>
    %17 = math.exp %16 : vector<2x8xf32>
    %cst_12 = arith.constant dense<0.000000e+00> : vector<2xf32>
    %18 = vector.multi_reduction <add>, %17, %cst_12 [1] : vector<2x8xf32> to vector<2xf32>
    %19 = vector.shape_cast %18 : vector<2xf32> to vector<2x1xf32>
    %20 = vector.broadcast %19 : vector<2x1xf32> to vector<2x8xf32>
    %21 = arith.divf %17, %20 : vector<2x8xf32>
    %c0_13 = arith.constant 0 : index
    %c0_14 = arith.constant 0 : index
    %22 = vector.load %arg6[%c0_13, %c0_14] : memref<2x8xf32, #tpu.memory_space<vmem>>, vector<2x8xf32>
    tpu.vector_store %arg6[%c0_13, %c0_14], %21 {strides = array<i32>} : memref<2x8xf32, #tpu.memory_space<vmem>>, vector<2x8xf32>,
    return
  }
  func.func @transform_0(%arg0: i32) -> (i32, i32) {
    %c0_i32 = arith.constant 0 : i32
    %c0_i32_0 = arith.constant 0 : i32
    return %arg0, %c0_i32 : i32, i32
  }
  func.func @transform_1(%arg0: i32) -> (i32, i32) {
    %c0_i32 = arith.constant 0 : i32
    %c0_i32_0 = arith.constant 0 : i32
    %c0_i32_1 = arith.constant 0 : i32
    return %c0_i32, %c0_i32_0 : i32, i32
  }
  func.func @transform_2(%arg0: i32) -> (i32, i32) {
    %c0_i32 = arith.constant 0 : i32
    %c0_i32_0 = arith.constant 0 : i32
    %c0_i32_1 = arith.constant 0 : i32
    return %c0_i32, %c0_i32_0 : i32, i32
  }
  func.func @transform_3(%arg0: i32) -> (i32, i32) {
    %c0_i32 = arith.constant 0 : i32
    %c0_i32_0 = arith.constant 0 : i32
    %c0_i32_1 = arith.constant 0 : i32
    return %c0_i32, %c0_i32_0 : i32, i32
  }
  func.func @transform_4(%arg0: i32) -> (i32, i32) {
    %c0_i32 = arith.constant 0 : i32
    %c0_i32_0 = arith.constant 0 : i32
    %c0_i32_1 = arith.constant 0 : i32
    return %c0_i32, %c0_i32_0 : i32, i32
  }
  func.func @transform_5(%arg0: i32) -> (i32, i32) {
    %c0_i32 = arith.constant 0 : i32
    %c0_i32_0 = arith.constant 0 : i32
    return %arg0, %c0_i32 : i32, i32
  }
}

</mosaic_0001>

<bundles_post_ra>
// kernel: smart_contract_forward.1
= control target key start
LH: loop header
LB: loop body
LE: loop exit
PB: predicated region body
PF: predicated region fallthrough
CT: control target
= control target key end

     0   :  { %vm28_vm0 = vcmask 130048   ;;  %s226_s0 = inlined_call_operand.vmem [shape: f32[2,16], index: 0, kind: input, shape index: {}]   ;;  %s227_s1 = inlined_call_operand.vmem [shape: f32[16,32], index: 1, kind: input, shape index: {}]   ;;  %s228_s2 = inlined_call_operand.vmem [shape: f32[1,32], index: 2, kind: input, shape index: {}]   ;;  %s229_s3 = inlined_call_operand.vmem [shape: f32[32,8], index: 3, kind: input, shape index: {}]   ;;  %s230_s4 = inlined_call_operand.vmem [shape: f32[1,8], index: 4, kind: input, shape index: {}]   ;;  %s231_s5 = inlined_call_operand.hbm [shape: f32[2,8], index: 5, kind: output, shape index: {}]  }
   0x1   :  { %v23_v0 = vld [vmem:[%s227_s1 + $0x8] sm:$0xff]  ;;  %v22_v1 = vld [vmem:[%s227_s1] sm:$0xff]  ;;  %v56_v3 = vld [vmem:[%s229_s3 + $0x18] sm:$0xff] }
   0x2   :  { %46 = vmatpush.msra.mxu0 %v23_v0  ;;  %v21_v2 = vld [vmem:[%s226_s0] sm:$0x3]  ;;  %77 = vmatpush.msra.mxu1 %v56_v3 }
   0x3   :  { %10 = vsyncpa [#allocation3], 0  ;;  %v55_v4 = vld [vmem:[%s229_s3 + $0x10] sm:$0xff]  ;;  %v54_v5 = vld [vmem:[%s229_s3 + $0x8] sm:$0xff]  ;;  %vm61_vm1 = vcmask 261120   ;;  %vm85_vm2 = vcmask 58368  }
   0x4   :  { %47 = vmatpush.msra.mxu0 %v22_v1  ;;  %78 = vmatpush.msra.mxu1 %v55_v4  ;;  %v53_v6 = vld [vmem:[%s229_s3] sm:$0xff]  ;;  %s118_s10 = sshll.u32 %s231_s5, 4  ;;  %s119_s10 = int_to_ptr.hbm [resolvable:$true] %s118_s10 }
   0x5   :  { %127 = vmatmul.msk.f32.vlgmr.msra.gmra.mxu0 %vm28_vm0, %v21_v2  ;;  %v130_v7 = vld [vmem:[%s228_s2] ss:$0 sm:$0xff]  ;;  %s162_s2 = smov [#allocation2]  }
   0x6   :  { %79 = vmatpush.msra.mxu1 %v54_v5  ;;  %v131_v11 = vld [vmem:[%s230_s4] ss:$0 sm:$0xff]  ;;  %s116_s3 = sshll.u32 %s162_s2, 4  ;;  %s117_s3 = int_to_ptr.vmem [resolvable:$true] %s116_s3 }
   0x8   :  { %80 = vmatpush.msra.mxu1 %v53_v6 }
  0x82   :  { %v49_v8 = vpop.f32.mrf.mxu0 }
  0x83   :  { %v50_v9 = vadd.f32 %v130_v7, %v49_v8 }
  0x85   :  { %v52_v10 = vmax.f32 %v50_v9, 0.0 }
  0x87   :  { %128 = vmatmul.msk.f32.vlgmr.msra.gmra.mxu1 %vm61_vm1, %v52_v10 }
 0x104   :  { %v82_v12 = vpop.f32.mrf.mxu1 }
 0x105   :  { %v83_v13 = vadd.f32 %v131_v11, %v82_v12 }
 0x107   :  { %v86_v14 = vsel %vm85_vm2, %v83_v13, -inf }
 0x108   :  { %87 = vmax.xlane.f32.xlu0 %v86_v14 }
 0x17b   :  { %v88_v15 = vpop.xlane.xlu0 %87 }
 0x17c   :  { %v89_v16 = vsub.f32 %v83_v13, %v88_v15 }
 0x17e   :  { %v90_v17 = vmul.f32 1.442695, %v89_v16 }
 0x180   :  { %132 = vpow2.f32 %v90_v17 }
 0x186   :  { %v133_v18 = vpop.eup %132 }
 0x187   :  { %v92_v19 = vsel %vm85_vm2, %v133_v18, 0.0 }
 0x188   :  { %93 = vadd.xlane.f32.xlu0 %v92_v19 }
 0x1fb   :  { %v94_v20 = vpop.xlane.xlu0 %93 }
 0x1fc   :  { %134 = vrcp.f32 %v94_v20  ;;  %v106_v24 = vand.u32 2147483648, %v94_v20  ;;  %v104_v26 = vand.u32 2147483647, %v94_v20  ;;  %vm100_vm4 = vweird.f32 %v94_v20 }
 0x1fe   :  { %v107_v28 = vor.u32 1.1754944e-38, %v106_v24  ;;  %vm105_vm6 = vcmp.eq.f32.partialorder %v104_v26, 8.507059e+37 }
 0x202   :  { %v135_v21 = vpop.eup %134 }
 0x203   :  { %v96_v22 = vmul.f32 %v135_v21, %v94_v20  ;;  %vm101_vm3 = vweird.f32 %v135_v21 }
 0x204   :  { %vm102_vm5 = vmor %vm100_vm4, %vm101_vm3 }
 0x205   :  { %v97_v23 = vsub.f32 1.0, %v96_v22 }
 0x207   :  { %v98_v25 = vmul.f32 %v135_v21, %v97_v23 }
 0x209   :  { %v99_v27 = vadd.f32 %v135_v21, %v98_v25 }
 0x20b   :  { %v103_v29 = vsel %vm102_vm5, %v135_v21, %v99_v27 }
 0x20c   :  { %v108_v30 = vsel %vm105_vm6, %v107_v28, %v103_v29 }
 0x20d   :  { %v109_v31 = vmul.f32 %v133_v18, %v108_v30 }
 0x20f   :  { %110 = vst.msk [vmem:[#allocation2] sm:$0x3] %vm85_vm2, %v109_v31 }
 0x210   :  { %121 = dma.vmem_to_hbm [thread:$0]  %s117_s3, 32, %s119_s10, [#allocation3]  }
 0x211   :  { %160 = dma.done.wait [#allocation3], 32  }
 0x212   :  { %161 = vsyncadd [#allocation3], 4294967264 }
 0x213   :  { %126 = vsyncpa [#allocation3], 1 }

</bundles_post_ra>
